<compile_context>
chip_gen: v7x
topology: tpu7x:2x2x1
jax: 0.10.0
libtpu: 0.0.40
codegen_flags: <defaults>
</compile_context>

<pallas_src>
import functools

import jax
import jax.numpy as jnp
from jax.experimental import pallas as pl
from jax.experimental.pallas import tpu as pltpu

_LANE = 128  # padded feature width for every layer


def _round_up(x, m):
    return ((x + m - 1) // m) * m


def _qnetwork_kernel(x_ref, w_ref, b_ref, out_ref, *, s_pad):
    """One batch tile of the whole MLP; weights stay VMEM-resident."""
    x = x_ref[...]  # (TILE_B, s_pad) f32

    # Layer 1: (s_pad -> 128)   [cols 64: are zero-padded]
    h = jnp.dot(x, w_ref[0:s_pad, :],
                preferred_element_type=jnp.float32) + b_ref[0:1, :]
    h = jnp.maximum(h, 0.0)

    # Layer 2: (128 -> 128)
    h = jnp.dot(h, w_ref[s_pad:s_pad + _LANE, :],
                preferred_element_type=jnp.float32) + b_ref[1:2, :]
    h = jnp.maximum(h, 0.0)

    # Layer 3: (128 -> 128)
    h = jnp.dot(h, w_ref[s_pad + _LANE:s_pad + 2 * _LANE, :],
                preferred_element_type=jnp.float32) + b_ref[2:3, :]
    h = jnp.maximum(h, 0.0)

    # Layer 4: (128 -> 128)   [only first action_size cols are real Q-values]
    q = jnp.dot(h, w_ref[s_pad + 2 * _LANE:s_pad + 3 * _LANE, :],
                preferred_element_type=jnp.float32) + b_ref[3:4, :]

    out_ref[...] = q.astype(out_ref.dtype)


@functools.partial(jax.jit, static_argnames=("action_size",))
def qnetwork_forward(x, w_all, b_all, *, action_size):
    """x: (B, state_size) f32. w_all: (s_pad + 384, 128). b_all: (8, 128)."""
    B, S = x.shape
    s_pad = w_all.shape[0] - 3 * _LANE

    # Batch tile: multiple of 8 sublanes; 256 rows fills the 256-wide MXU on
    # v6e/v7x, smaller batches just use one tile.
    tile_b = min(256, _round_up(B, 8))
    b_pad = _round_up(B, tile_b)

    # Zero-pad batch rows and state columns to the tiled/padded shapes.
    x_p = jnp.zeros((b_pad, s_pad), jnp.float32).at[:B, :S].set(x)

    kernel = functools.partial(_qnetwork_kernel, s_pad=s_pad)
    out = pl.pallas_call(
        kernel,
        out_shape=jax.ShapeDtypeStruct((b_pad, _LANE), jnp.float32),
        grid=(b_pad // tile_b,),
        in_specs=[
            # streaming input tile
            pl.BlockSpec((tile_b, s_pad), lambda i: (i, 0)),
            # packed weights / biases: constant block index -> fetched once,
            # resident across all batch tiles.
            pl.BlockSpec(w_all.shape, lambda i: (0, 0)),
            pl.BlockSpec(b_all.shape, lambda i: (0, 0)),
        ],
        out_specs=pl.BlockSpec((tile_b, _LANE), lambda i: (i, 0)),
        compiler_params=pltpu.CompilerParams(
            dimension_semantics=("parallel",)),  # dual-TC sharding on v7x
    )(x_p, w_all, b_all)

    return out[:B, :action_size]


def init_qnetwork_params(state_size, action_size, seed=0):
    """Deterministic parameter init (PyTorch-style uniform fan-in bounds).

    Weights are stored (in_features, out_features) == W^T of torch layout.
    """
    key = jax.random.PRNGKey(seed)
    dims = [(state_size, 64), (64, 64), (64, 128), (128, action_size)]
    params = {}
    for i, (fan_in, fan_out) in enumerate(dims, start=1):
        key, kw, kb = jax.random.split(key, 3)
        bound = 1.0 / jnp.sqrt(jnp.float32(fan_in))
        params[f"w{i}"] = jax.random.uniform(
            kw, (fan_in, fan_out), jnp.float32, -bound, bound)
        params[f"b{i}"] = jax.random.uniform(
            kb, (1, fan_out), jnp.float32, -bound, bound)
    return params


def pack_qnetwork_params(params, state_size, action_size):
    """Zero-pad every layer to 128 lanes and stack into two slabs.

    Returns:
      w_all: (s_pad + 3*128, 128) f32 — [w1; w2; w3; w4] row-stacked.
      b_all: (8, 128) f32            — rows 0..3 are b1..b4, rest zero.
    """
    s_pad = max(8, _round_up(state_size, 8))
    w_all = jnp.zeros((s_pad + 3 * _LANE, _LANE), jnp.float32)
    w_all = w_all.at[:state_size, :64].set(params["w1"])
    w_all = w_all.at[s_pad:s_pad + 64, :64].set(params["w2"])
    w_all = w_all.at[s_pad + _LANE:s_pad + _LANE + 64, :128].set(params["w3"])
    w_all = w_all.at[s_pad + 2 * _LANE:s_pad + 3 * _LANE,
                     :action_size].set(params["w4"])

    b_all = jnp.zeros((8, _LANE), jnp.float32)
    b_all = b_all.at[0, :64].set(params["b1"][0])
    b_all = b_all.at[1, :64].set(params["b2"][0])
    b_all = b_all.at[2, :128].set(params["b3"][0])
    b_all = b_all.at[3, :action_size].set(params["b4"][0])
    return w_all, b_all


def qnetwork_reference(x, params):
    """Pure-JAX reference for correctness checking."""
    h = jnp.maximum(x @ params["w1"] + params["b1"], 0.0)
    h = jnp.maximum(h @ params["w2"] + params["b2"], 0.0)
    h = jnp.maximum(h @ params["w3"] + params["b3"], 0.0)
    return h @ params["w4"] + params["b4"]


if __name__ == "__main__":
    state_size = 16
    action_size = 4
    batch = 8
    seed = 0

    params = init_qnetwork_params(state_size, action_size, seed=seed)
    w_all, b_all = pack_qnetwork_params(params, state_size, action_size)

    key = jax.random.PRNGKey(0)
    x = jax.random.normal(key, (batch, state_size), dtype=jnp.float32)

    q = qnetwork_forward(x, w_all, b_all, action_size=action_size)
    q = jax.block_until_ready(q)

    q_ref = qnetwork_reference(x, params)
    assert q.shape == (batch, action_size)
    assert jnp.allclose(q, q_ref, atol=1e-5, rtol=1e-5), "mismatch vs reference"

    # Also exercise a larger, multi-tile batch to check the grid path.
    xb = jax.random.normal(jax.random.PRNGKey(1), (600, state_size), jnp.float32)
    qb = jax.block_until_ready(
        qnetwork_forward(xb, w_all, b_all, action_size=action_size))
    qb_ref = qnetwork_reference(xb, params)
    assert qb.shape == (600, action_size)
    assert jnp.allclose(qb, qb_ref, atol=1e-4, rtol=1e-4), "mismatch (big batch)"

    print("KERNEL_OK")
</pallas_src>

<mosaic_0001>
module attributes {stable_mosaic.version = 11 : i64} {
  func.func @_qnetwork_kernel(%arg0: i32, %arg1: memref<8x16xf32, #tpu.memory_space<vmem>>, %arg2: memref<400x128xf32, #tpu.memory_space<vmem>>, %arg3: memref<8x128xf32, #tpu.memory_space<vmem>>, %arg4: memref<8x128xf32, #tpu.memory_space<vmem>>) attributes {dimension_semantics = [#tpu.dimension_semantics<parallel>], iteration_bounds = array<i64: 1>, scalar_prefetch = 0 : i64, scratch_operands = 0 : i64, tpu.core_type = #tpu.core_type<tc>, window_params = [{transform_indices = @transform_0, window_bounds = array<i64: 8, 16>}, {pipeline_mode = #tpu.pipeline_mode<synchronous>, transform_indices = @transform_1, window_bounds = array<i64: 400, 128>}, {pipeline_mode = #tpu.pipeline_mode<synchronous>, transform_indices = @transform_2, window_bounds = array<i64: 8, 128>}, {transform_indices = @transform_3, window_bounds = array<i64: 8, 128>}]} {
    %c0 = arith.constant 0 : index
    %c0_0 = arith.constant 0 : index
    %0 = vector.load %arg1[%c0, %c0_0] : memref<8x16xf32, #tpu.memory_space<vmem>>, vector<8x16xf32>
    %c0_1 = arith.constant 0 : index
    %c0_2 = arith.constant 0 : index
    %1 = vector.load %arg2[%c0_1, %c0_2] : memref<400x128xf32, #tpu.memory_space<vmem>>, vector<16x128xf32>
    %cst = arith.constant dense<0.000000e+00> : vector<8x128xf32>
    %2 = tpu.matmul %0, %1, %cst {dimension_numbers = #tpu.dot_dimension_numbers<[1], [0], [0], [1], [0, 0, 1, 1], [], []>} : vector<8x16xf32>, vector<16x128xf32>, vector<8x128xf32> -> vector<8x128xf32>
    %c0_3 = arith.constant 0 : index
    %c0_4 = arith.constant 0 : index
    %3 = vector.load %arg3[%c0_3, %c0_4] : memref<8x128xf32, #tpu.memory_space<vmem>>, vector<1x128xf32>
    %4 = vector.broadcast %3 : vector<1x128xf32> to vector<8x128xf32>
    %5 = arith.addf %2, %4 : vector<8x128xf32>
    %cst_5 = arith.constant 0.000000e+00 : f32
    %6 = vector.broadcast %cst_5 : f32 to vector<8x128xf32>
    %7 = arith.maximumf %5, %6 : vector<8x128xf32>
    %c16 = arith.constant 16 : index
    %c0_6 = arith.constant 0 : index
    %8 = vector.load %arg2[%c16, %c0_6] : memref<400x128xf32, #tpu.memory_space<vmem>>, vector<128x128xf32>
    %cst_7 = arith.constant dense<0.000000e+00> : vector<8x128xf32>
    %9 = tpu.matmul %7, %8, %cst_7 {dimension_numbers = #tpu.dot_dimension_numbers<[1], [0], [0], [1], [0, 0, 1, 1], [], []>} : vector<8x128xf32>, vector<128x128xf32>, vector<8x128xf32> -> vector<8x128xf32>
    %c1 = arith.constant 1 : index
    %c0_8 = arith.constant 0 : index
    %10 = vector.load %arg3[%c1, %c0_8] : memref<8x128xf32, #tpu.memory_space<vmem>>, vector<1x128xf32>
    %11 = vector.broadcast %10 : vector<1x128xf32> to vector<8x128xf32>
    %12 = arith.addf %9, %11 : vector<8x128xf32>
    %cst_9 = arith.constant 0.000000e+00 : f32
    %13 = vector.broadcast %cst_9 : f32 to vector<8x128xf32>
    %14 = arith.maximumf %12, %13 : vector<8x128xf32>
    %c144 = arith.constant 144 : index
    %c0_10 = arith.constant 0 : index
    %15 = vector.load %arg2[%c144, %c0_10] : memref<400x128xf32, #tpu.memory_space<vmem>>, vector<128x128xf32>
    %cst_11 = arith.constant dense<0.000000e+00> : vector<8x128xf32>
    %16 = tpu.matmul %14, %15, %cst_11 {dimension_numbers = #tpu.dot_dimension_numbers<[1], [0], [0], [1], [0, 0, 1, 1], [], []>} : vector<8x128xf32>, vector<128x128xf32>, vector<8x128xf32> -> vector<8x128xf32>
    %c2 = arith.constant 2 : index
    %c0_12 = arith.constant 0 : index
    %17 = vector.load %arg3[%c2, %c0_12] : memref<8x128xf32, #tpu.memory_space<vmem>>, vector<1x128xf32>
    %18 = vector.broadcast %17 : vector<1x128xf32> to vector<8x128xf32>
    %19 = arith.addf %16, %18 : vector<8x128xf32>
    %cst_13 = arith.constant 0.000000e+00 : f32
    %20 = vector.broadcast %cst_13 : f32 to vector<8x128xf32>
    %21 = arith.maximumf %19, %20 : vector<8x128xf32>
    %c272 = arith.constant 272 : index
    %c0_14 = arith.constant 0 : index
    %22 = vector.load %arg2[%c272, %c0_14] : memref<400x128xf32, #tpu.memory_space<vmem>>, vector<128x128xf32>
    %cst_15 = arith.constant dense<0.000000e+00> : vector<8x128xf32>
    %23 = tpu.matmul %21, %22, %cst_15 {dimension_numbers = #tpu.dot_dimension_numbers<[1], [0], [0], [1], [0, 0, 1, 1], [], []>} : vector<8x128xf32>, vector<128x128xf32>, vector<8x128xf32> -> vector<8x128xf32>
    %c3 = arith.constant 3 : index
    %c0_16 = arith.constant 0 : index
    %24 = vector.load %arg3[%c3, %c0_16] : memref<8x128xf32, #tpu.memory_space<vmem>>, vector<1x128xf32>
    %25 = vector.broadcast %24 : vector<1x128xf32> to vector<8x128xf32>
    %26 = arith.addf %23, %25 : vector<8x128xf32>
    %c0_17 = arith.constant 0 : index
    %c0_18 = arith.constant 0 : index
    %27 = vector.load %arg4[%c0_17, %c0_18] : memref<8x128xf32, #tpu.memory_space<vmem>>, vector<8x128xf32>
    tpu.vector_store %arg4[%c0_17, %c0_18], %26 {strides = array<i32>} : memref<8x128xf32, #tpu.memory_space<vmem>>, vector<8x128xf32>,
    return
  }
  func.func @transform_0(%arg0: i32) -> (i32, i32) {
    %c0_i32 = arith.constant 0 : i32
    %c0_i32_0 = arith.constant 0 : i32
    return %arg0, %c0_i32 : i32, i32
  }
  func.func @transform_1(%arg0: i32) -> (i32, i32) {
    %c0_i32 = arith.constant 0 : i32
    %c0_i32_0 = arith.constant 0 : i32
    %c0_i32_1 = arith.constant 0 : i32
    return %c0_i32, %c0_i32_0 : i32, i32
  }
  func.func @transform_2(%arg0: i32) -> (i32, i32) {
    %c0_i32 = arith.constant 0 : i32
    %c0_i32_0 = arith.constant 0 : i32
    %c0_i32_1 = arith.constant 0 : i32
    return %c0_i32, %c0_i32_0 : i32, i32
  }
  func.func @transform_3(%arg0: i32) -> (i32, i32) {
    %c0_i32 = arith.constant 0 : i32
    %c0_i32_0 = arith.constant 0 : i32
    return %arg0, %c0_i32 : i32, i32
  }
}

</mosaic_0001>

<bundles_post_ra>
// kernel: qnetwork_forward.1
= control target key start
LH: loop header
LB: loop body
LE: loop exit
PB: predicated region body
PF: predicated region fallthrough
CT: control target
= control target key end

     0   :  { %8 = vsyncpa [#allocation3], 0  ;;  %s840_s0 = inlined_call_operand.hbm [shape: f32[8,16], index: 0, kind: input, shape index: {}]   ;;  %s841_s1 = inlined_call_operand.hbm [shape: f32[400,128], index: 1, kind: input, shape index: {}]   ;;  %s842_s2 = inlined_call_operand.hbm [shape: f32[8,128], index: 2, kind: input, shape index: {}]   ;;  %s843_s3 = inlined_call_operand.vmem [shape: f32[8,128], index: 3, kind: output, shape index: {}]  }
   0x1   :  { %9 = vsyncpa [#allocation5], 0  ;;  %s740_s12 = smov [#allocation4]   ;;  %s670_s16 = scalar_lea.hbm %s841_s1, 6400 }
   0x2   :  { %s25_s13 = sshll.u32 %s740_s12, 4  ;;  %p671_p0 = scmp.ne.s32.totalorder %s841_s1, %s670_s16  ;;  %s26_s13 = int_to_ptr.vmem [resolvable:$true] %s25_s13 }
   0x3   :  { %p674_p1 = scmp.lt.u32.totalorder %s670_s16, %s841_s1 }
   0x5   :  { %p676_p2 = pnand %p674_p1, %p671_p0 }
   0x7   :  { %679 = shalt.err (!%p676_p2)
}
   0x8   :  { %s680_s21 = scalar_lea.vmem %s26_s13, 6400  ;;  %p685_p4 = scmp.lt.s32.totalorder %s26_s13, %s26_s13 }
   0x9   :  { %p681_p3 = scmp.ne.s32.totalorder %s26_s13, %s680_s21  ;;  %p686_p5 = scmp.lt.s32.totalorder %s680_s21, %s680_s21 }
   0xb   :  { %p687_p6 = por %p686_p5, %p685_p4 }
   0xd   :  { %p688_p7 = pnand %p687_p6, %p681_p3 }
   0xf   :  { %691 = shalt.err (!%p688_p7)
}
  0x10   :  { %s741_s22 = smov 128   ;;  %s742_s23 = smov 8  }
  0x11   :  { %31 = dma.hbm_to_vmem [thread:$0]  %s841_s1, 6400, %s26_s13, [#allocation5], %s741_s22, %s741_s22, %s742_s23  }
  0x12   :  { %s743_s26 = smov [#allocation2]   ;;  %s744_s28 = smov [#allocation6]  }
  0x13   :  { %s16_s27 = sshll.u32 %s743_s26, 4  ;;  %s38_s29 = sshll.u32 %s744_s28, 4  ;;  %s17_s27 = int_to_ptr.vmem [resolvable:$true] %s16_s27  ;;  %s39_s29 = int_to_ptr.vmem [resolvable:$true] %s38_s29 }
  0x14   :  { %s692_s5 = scalar_lea.hbm %s840_s0, 128 }
  0x15   :  { %p693_p8 = scmp.ne.s32.totalorder %s840_s0, %s692_s5  ;;  %p696_p9 = scmp.lt.u32.totalorder %s692_s5, %s840_s0 }
  0x17   :  { %p698_p10 = pnand %p696_p9, %p693_p8 }
  0x19   :  { %701 = shalt.err (!%p698_p10)
}
  0x1a   :  { %s702_s1 = scalar_lea.vmem %s17_s27, 128  ;;  %p707_p12 = scmp.lt.s32.totalorder %s17_s27, %s17_s27 }
  0x1b   :  { %p703_p11 = scmp.ne.s32.totalorder %s17_s27, %s702_s1  ;;  %p708_p13 = scmp.lt.s32.totalorder %s702_s1, %s702_s1 }
  0x1d   :  { %p709_p0 = por %p708_p13, %p707_p12 }
  0x1f   :  { %p710_p1 = pnand %p709_p0, %p703_p11 }
  0x21   :  { %713 = shalt.err (!%p710_p1)
}
  0x22   :  { %19 = dma.hbm_to_vmem [thread:$0]  %s840_s0, 128, %s17_s27, [#allocation3]  }
  0x23   :  { %s714_s14 = scalar_lea.hbm %s842_s2, 128 }
  0x24   :  { %p715_p2 = scmp.ne.s32.totalorder %s842_s2, %s714_s14  ;;  %p718_p3 = scmp.lt.u32.totalorder %s714_s14, %s842_s2 }
  0x26   :  { %p720_p4 = pnand %p718_p3, %p715_p2 }
  0x28   :  { %723 = shalt.err (!%p720_p4)
}
  0x29   :  { %s724_s19 = scalar_lea.vmem %s39_s29, 128  ;;  %p729_p6 = scmp.lt.s32.totalorder %s39_s29, %s39_s29 }
  0x2a   :  { %p725_p5 = scmp.ne.s32.totalorder %s39_s29, %s724_s19  ;;  %p730_p7 = scmp.lt.s32.totalorder %s724_s19, %s724_s19 }
  0x2c   :  { %p731_p8 = por %p730_p7, %p729_p6 }
  0x2e   :  { %p732_p9 = pnand %p731_p8, %p725_p5 }
  0x30   :  { %735 = shalt.err (!%p732_p9)
}
  0x31   :  { %41 = dma.hbm_to_vmem [thread:$0]  %s842_s2, 128, %s39_s29, [#allocation5]  }
  0x32   :  { %736 = dma.done.wait [#allocation3], 128  }
  0x33   :  { %737 = vsyncadd [#allocation3], 4294967168 }
  0x34   :  { %738 = dma.done.wait [#allocation5], 6528  }
  0x35   :  { %739 = vsyncadd [#allocation5], 4294960768  ;;  %v745_v0 = vmov 0.0|0.0   ;;  %vm746_vm0 = vmmov 0   ;;  %v747_v1 = vmov 0.0   ;;  %v52_v2 = vld [vmem:[#allocation4] sm:$0xff] }
  0x36   :  { %587 = vmatprep.subr.bf16.mxu0 %v745_v0  ;;  %479 = vmatprep.mubr.msk.f32.mxu0 %vm746_vm0, %v747_v1  ;;  %v53_v3 = vld [vmem:[#allocation4 + $0x8] sm:$0xff]  ;;  %v134_v5 = vld [vmem:[#allocation4 + $0x10] sm:$0xff]  ;;  %v135_v6 = vld [vmem:[#allocation4 + $0x18] sm:$0xff]  ;;  %vm59_vm1 = vcmask 130048  }
  0x37   :  { %590 = vmatprep.subr.bf16.mxu1 %v745_v0  ;;  %514 = vmatprep.mubr.msk.f32.mxu1 %vm746_vm0, %v747_v1  ;;  %v588_v4 = vpack.c.bf16 %v53_v3, %v52_v2  ;;  %v136_v7 = vld [vmem:[#allocation4 + $0x20] sm:$0xff]  ;;  %v591_v8 = vpack.c.bf16 %v135_v6, %v134_v5  ;;  %v137_v9 = vld [vmem:[#allocation4 + $0x28] sm:$0xff]  ;;  %v51_v10 = vld [vmem:[#allocation2] sm:$0xff] }
  0x38   :  { %v594_v11 = vpack.c.bf16 %v137_v9, %v136_v7  ;;  %v138_v12 = vld [vmem:[#allocation4 + $0x30] sm:$0xff]  ;;  %v139_v13 = vld [vmem:[#allocation4 + $0x38] sm:$0xff]  ;;  %v140_v15 = vld [vmem:[#allocation4 + $0x40] sm:$0xff] }
  0x39   :  { %589 = vmatpush3.bf16.msra.mxu0 %v588_v4  ;;  %592 = vmatpush3.bf16.msra.mxu1 %v591_v8  ;;  %v597_v14 = vpack.c.bf16 %v139_v13, %v138_v12  ;;  %v141_v16 = vld [vmem:[#allocation4 + $0x48] sm:$0xff]  ;;  %v142_v18 = vld [vmem:[#allocation4 + $0x50] sm:$0xff]  ;;  %v143_v19 = vld [vmem:[#allocation4 + $0x58] sm:$0xff] }
  0x3a   :  { %614 = vmatprep.subr.bf16.mxu0 %v745_v0  ;;  %593 = vmatprep.subr.bf16.mxu1 %v745_v0  ;;  %v600_v17 = vpack.c.bf16 %v141_v16, %v140_v15  ;;  %v603_v20 = vpack.c.bf16 %v143_v19, %v142_v18  ;;  %v144_v21 = vld [vmem:[#allocation4 + $0x60] sm:$0xff]  ;;  %v145_v22 = vld [vmem:[#allocation4 + $0x68] sm:$0xff]  ;;  %v146_v24 = vld [vmem:[#allocation4 + $0x70] sm:$0xff] }
  0x3b   :  { %v606_v23 = vpack.c.bf16 %v145_v22, %v144_v21  ;;  %v147_v25 = vld [vmem:[#allocation4 + $0x78] sm:$0xff]  ;;  %v148_v27 = vld [vmem:[#allocation4 + $0x80] sm:$0xff]  ;;  %v149_v28 = vld [vmem:[#allocation4 + $0x88] sm:$0xff] }
  0x3c   :  { %480 = vmatmul.mubr.msk.f32.vlgmr.msra.gmra.mrb[0].mxu0 %vm59_vm1, %v51_v10  ;;  %v609_v26 = vpack.c.bf16 %v147_v25, %v146_v24  ;;  %v612_v29 = vpack.c.bf16 %v149_v28, %v148_v27  ;;  %v226_v30 = vld [vmem:[#allocation4 + $0x90] sm:$0xff]  ;;  %v227_v31 = vld [vmem:[#allocation4 + $0x98] sm:$0xff]  ;;  %v228_v32 = vld [vmem:[#allocation4 + $0xa0] sm:$0xff] }
  0x3d   :  { %549 = vmatprep.mubr.msk.f32.mxu0 %vm746_vm0, %v747_v1  ;;  %595 = vmatpush3.bf16.msra.mxu1 %v594_v11  ;;  %v615_v33 = vpack.c.bf16 %v227_v31, %v226_v30  ;;  %v229_v34 = vld [vmem:[#allocation4 + $0xa8] sm:$0xff]  ;;  %v230_v36 = vld [vmem:[#allocation4 + $0xb0] sm:$0xff]  ;;  %v231_v37 = vld [vmem:[#allocation4 + $0xb8] sm:$0xff] }
  0x3e   :  { %596 = vmatprep.subr.bf16.mxu1 %v745_v0  ;;  %v618_v35 = vpack.c.bf16 %v229_v34, %v228_v32  ;;  %v621_v38 = vpack.c.bf16 %v231_v37, %v230_v36  ;;  %v232_v39 = vld [vmem:[#allocation4 + $0xc0] sm:$0xff]  ;;  %v233_v40 = vld [vmem:[#allocation4 + $0xc8] sm:$0xff]  ;;  %v234_v42 = vld [vmem:[#allocation4 + $0xd0] sm:$0xff] }
  0x3f   :  { %616 = vmatpush3.bf16.msra.mxu0 %v615_v33  ;;  %v624_v41 = vpack.c.bf16 %v233_v40, %v232_v39  ;;  %v235_v43 = vld [vmem:[#allocation4 + $0xd8] sm:$0xff]  ;;  %v236_v45 = vld [vmem:[#allocation4 + $0xe0] sm:$0xff]  ;;  %v237_v46 = vld [vmem:[#allocation4 + $0xe8] sm:$0xff] }
  0x40   :  { %617 = vmatprep.subr.bf16.mxu0 %v745_v0  ;;  %v627_v44 = vpack.c.bf16 %v235_v43, %v234_v42  ;;  %v630_v47 = vpack.c.bf16 %v237_v46, %v236_v45  ;;  %v238_v48 = vld [vmem:[#allocation4 + $0xf0] sm:$0xff]  ;;  %v239_v49 = vld [vmem:[#allocation4 + $0xf8] sm:$0xff]  ;;  %v240_v56 = vld [vmem:[#allocation4 + $0x100] sm:$0xff] }
  0x41   :  { %598 = vmatpush3.bf16.msra.mxu1 %v597_v14  ;;  %v633_v50 = vpack.c.bf16 %v239_v49, %v238_v48  ;;  %v416_v51 = vld [vmem:[#allocation6] ss:$0 sm:$0xff]  ;;  %v241_v57 = vld [vmem:[#allocation4 + $0x108] sm:$0xff]  ;;  %v319_v60 = vld [vmem:[#allocation4 + $0x118] sm:$0xff] }
  0x42   :  { %599 = vmatprep.subr.bf16.mxu1 %v745_v0  ;;  %v636_v58 = vpack.c.bf16 %v241_v57, %v240_v56  ;;  %v318_v59 = vld [vmem:[#allocation4 + $0x110] sm:$0xff]  ;;  %v320_v61 = vld [vmem:[#allocation4 + $0x120] sm:$0xff]  ;;  %v321_v63 = vld [vmem:[#allocation4 + $0x128] sm:$0xff] }
  0x43   :  { %619 = vmatpush3.bf16.msra.mxu0 %v618_v35  ;;  %v639_v62 = vpack.c.bf16 %v319_v60, %v318_v59  ;;  %v642_v2 = vpack.c.bf16 %v321_v63, %v320_v61  ;;  %v322_v3 = vld [vmem:[#allocation4 + $0x130] sm:$0xff]  ;;  %v323_v4 = vld [vmem:[#allocation4 + $0x138] sm:$0xff]  ;;  %v325_v6 = vld [vmem:[#allocation4 + $0x148] sm:$0xff] }
  0x44   :  { %620 = vmatprep.subr.bf16.mxu0 %v745_v0  ;;  %v645_v5 = vpack.c.bf16 %v323_v4, %v322_v3  ;;  %v326_v8 = vld [vmem:[#allocation4 + $0x150] sm:$0xff]  ;;  %v327_v9 = vld [vmem:[#allocation4 + $0x158] sm:$0xff]  ;;  %v328_v11 = vld [vmem:[#allocation4 + $0x160] sm:$0xff] }
  0x45   :  { %601 = vmatpush3.bf16.msra.mxu1 %v600_v17  ;;  %v651_v10 = vpack.c.bf16 %v327_v9, %v326_v8  ;;  %v329_v12 = vld [vmem:[#allocation4 + $0x168] sm:$0xff]  ;;  %v330_v14 = vld [vmem:[#allocation4 + $0x170] sm:$0xff]  ;;  %v331_v15 = vld [vmem:[#allocation4 + $0x178] sm:$0xff] }
  0x46   :  { %602 = vmatprep.subr.bf16.mxu1 %v745_v0  ;;  %v654_v13 = vpack.c.bf16 %v329_v12, %v328_v11  ;;  %v657_v16 = vpack.c.bf16 %v331_v15, %v330_v14  ;;  %v418_v17 = vld [vmem:[#allocation6 + $0x1] ss:$0 sm:$0xff]  ;;  %v332_v22 = vld [vmem:[#allocation4 + $0x180] sm:$0xff]  ;;  %v419_v25 = vld [vmem:[#allocation6 + $0x2] ss:$0 sm:$0xff] }
  0x47   :  { %622 = vmatpush3.bf16.msra.mxu0 %v621_v38  ;;  %v420_v30 = vld [vmem:[#allocation6 + $0x3] ss:$0 sm:$0xff] }
  0x48   :  { %623 = vmatprep.subr.bf16.mxu0 %v745_v0 }
  0x49   :  { %604 = vmatpush3.bf16.msra.mxu1 %v603_v20 }
  0x4a   :  { %605 = vmatprep.subr.bf16.mxu1 %v745_v0 }
  0x4b   :  { %625 = vmatpush3.bf16.msra.mxu0 %v624_v41 }
  0x4c   :  { %626 = vmatprep.subr.bf16.mxu0 %v745_v0 }
  0x4d   :  { %607 = vmatpush3.bf16.msra.mxu1 %v606_v23  ;;  %v333_v23 = vld [vmem:[#allocation4 + $0x188] sm:$0xff] }
  0x4e   :  { %608 = vmatprep.subr.bf16.mxu1 %v745_v0  ;;  %v660_v24 = vpack.c.bf16 %v333_v23, %v332_v22 }
  0x4f   :  { %628 = vmatpush3.bf16.msra.mxu0 %v627_v44 }
  0x50   :  { %629 = vmatprep.subr.bf16.mxu0 %v745_v0 }
  0x51   :  { %610 = vmatpush3.bf16.msra.mxu1 %v609_v26 }
  0x52   :  { %611 = vmatprep.subr.bf16.mxu1 %v745_v0 }
  0x53   :  { %631 = vmatpush3.bf16.msra.mxu0 %v630_v47 }
  0x54   :  { %632 = vmatprep.subr.bf16.mxu0 %v745_v0 }
  0x55   :  { %613 = vmatpush3.bf16.msra.mxu1 %v612_v29 }
  0x56   :  { %638 = vmatprep.subr.bf16.mxu1 %v745_v0 }
  0x57   :  { %634 = vmatpush3.bf16.msra.mxu0 %v633_v50 }
  0x58   :  { %635 = vmatprep.subr.bf16.mxu0 %v745_v0 }
  0x5b   :  { %637 = vmatpush3.bf16.msra.mxu0 %v636_v58 }
 0x10f   :  { %v129_v52 = vpop.f32.mrb[0].mxu0 }
 0x110   :  { %v130_v53 = vadd.f32 %v416_v51, %v129_v52  ;;  %v481_v54 = vpop.f32.mrb[1].mxu0 }
 0x112   :  { %v133_v55 = vmax.f32 %v130_v53, 0.0 }
 0x114   :  { %515 = vmatmul.mubr.f32.vlgmr.msra.gmra.mrb[0].mxu1 %v133_v55 }
 0x115   :  { %584 = vmatprep.mubr.msk.f32.mxu1 %vm746_vm0, %v747_v1  ;;  %640 = vmatpush3.bf16.msra.mxu1 %v639_v62  ;;  %v324_v1 = vld [vmem:[#allocation4 + $0x140] sm:$0xff] }
 0x116   :  { %641 = vmatprep.subr.bf16.mxu1 %v745_v0  ;;  %v648_v7 = vpack.c.bf16 %v325_v6, %v324_v1 }
 0x119   :  { %643 = vmatpush3.bf16.msra.mxu1 %v642_v2 }
 0x11a   :  { %644 = vmatprep.subr.bf16.mxu1 %v745_v0 }
 0x11d   :  { %646 = vmatpush3.bf16.msra.mxu1 %v645_v5 }
 0x11e   :  { %647 = vmatprep.subr.bf16.mxu1 %v745_v0 }
 0x121   :  { %649 = vmatpush3.bf16.msra.mxu1 %v648_v7 }
 0x122   :  { %650 = vmatprep.subr.bf16.mxu1 %v745_v0 }
 0x125   :  { %652 = vmatpush3.bf16.msra.mxu1 %v651_v10 }
 0x126   :  { %653 = vmatprep.subr.bf16.mxu1 %v745_v0 }
 0x129   :  { %655 = vmatpush3.bf16.msra.mxu1 %v654_v13 }
 0x12a   :  { %656 = vmatprep.subr.bf16.mxu1 %v745_v0 }
 0x12d   :  { %658 = vmatpush3.bf16.msra.mxu1 %v657_v16 }
 0x12e   :  { %659 = vmatprep.subr.bf16.mxu1 %v745_v0 }
 0x131   :  { %661 = vmatpush3.bf16.msra.mxu1 %v660_v24 }
 0x1e7   :  { %v221_v18 = vpop.f32.mrb[0].mxu1 }
 0x1e8   :  { %v222_v19 = vadd.f32 %v418_v17, %v221_v18  ;;  %v516_v20 = vpop.f32.mrb[1].mxu1 }
 0x1ea   :  { %v225_v21 = vmax.f32 %v222_v19, 0.0 }
 0x1ec   :  { %550 = vmatmul.mubr.f32.vlgmr.msra.gmra.mrb[2].mxu0 %v225_v21 }
 0x2bf   :  { %v313_v26 = vpop.f32.mrb[2].mxu0 }
 0x2c0   :  { %v314_v27 = vadd.f32 %v419_v25, %v313_v26  ;;  %v551_v28 = vpop.f32.mrb[3].mxu0 }
 0x2c2   :  { %v317_v29 = vmax.f32 %v314_v27, 0.0 }
 0x2c4   :  { %585 = vmatmul.mubr.f32.vlgmr.msra.gmra.mrb[2].mxu1 %v317_v29 }
 0x397   :  { %v405_v31 = vpop.f32.mrb[2].mxu1 }
 0x398   :  { %v406_v32 = vadd.f32 %v420_v30, %v405_v31  ;;  %v586_v0 = vpop.f32.mrb[3].mxu1 }
 0x39a   :  { %409 = vst [vmem:[%s843_s3] sm:$0xff] %v406_v32 }
 0x39b   :  { %414 = vsyncpa [#allocation3], 1 }
 0x39c   :  { %415 = vsyncpa [#allocation5], 1 }

</bundles_post_ra>
